<compile_context>
chip_gen: v7x
topology: tpu7x:2x2x1
jax: 0.10.0
libtpu: 0.0.40
codegen_flags: <defaults>
</compile_context>

<pallas_src>
import jax
import jax.numpy as jnp
from jax.experimental import pallas as pl
from jax.experimental.pallas import tpu as pltpu

_LANES = 128
_SUBLANES = 8


def _round_up(x, m):
    return (x + m - 1) // m * m


def _symm_matmul_kernel(x_ref, w_ref, b_ref, o_ref):
    """out[i-tile] = x[i-tile] @ W_stacked + nIntPts * bias  (single K block)."""
    acc = jnp.dot(x_ref[...], w_ref[...], preferred_element_type=jnp.float32)
    o_ref[...] = (acc + b_ref[...]).astype(o_ref.dtype)


def _build_symm_weight(weight, nIntPts):
    """Assemble W_stacked (3*nIntPts, 3): rows 3i..3i+2 = M_i^T @ M_i."""
    w = jnp.asarray(weight)[:nIntPts, :6].astype(jnp.float32)
    a = jax.nn.softplus(w[:, 0])
    b = w[:, 1]
    c = w[:, 2]
    d = jax.nn.softplus(w[:, 3])
    e = w[:, 4]
    f = jax.nn.softplus(w[:, 5])
    r0 = jnp.stack([a * a, a * b, a * c], axis=-1)
    r1 = jnp.stack([a * b, b * b + d * d, b * c + d * e], axis=-1)
    r2 = jnp.stack([a * c, b * c + d * e, c * c + e * e + f * f], axis=-1)
    return jnp.stack([r0, r1, r2], axis=1).reshape(3 * nIntPts, 3)


def symm_layer_forward(x, weight, bias, nIntPts, *, tm=512, matmul_dtype=None):
    """symmLayer forward.

    x: (batch, 3*nIntPts) or (3*nIntPts,); weight: (nIntPts, >=6);
    bias: (3,) or None (this is `tied_to.bias`, added once per int. point).
    Returns (batch, 3) float32 (or (3,) for 1-D input), matching torch.
    """
    x = jnp.asarray(x)
    squeeze = (x.ndim == 1)
    if squeeze:
        x = x[None, :]
    batch = x.shape[0]
    K = 3 * nIntPts

    # Compute dtype for the MXU feed: keep bf16 if the caller supplies it
    # (halves x HBM read traffic); otherwise f32.  f32 accumulation always.
    if matmul_dtype is None:
        matmul_dtype = x.dtype if x.dtype in (jnp.bfloat16, jnp.float32) else jnp.float32
    x = x[:, :K].astype(matmul_dtype)

    # One-time weight transform (softplus + symmetric 3x3 blocks), hoisted out
    # of the pipelined matmul so no EUP work runs per batch tile.
    w_stacked = _build_symm_weight(weight, nIntPts).astype(matmul_dtype)   # (K, 3)

    # Bias: the torch loop adds tied_to.bias once per integration point.
    b = jnp.zeros((1, 3), jnp.float32)
    if bias is not None:
        b = (jnp.asarray(bias, jnp.float32) * nIntPts).reshape(1, 3)

    # --- batch tile selection ------------------------------------------------
    b8 = _round_up(batch, _SUBLANES)
    tm_eff = max(_SUBLANES, min(_round_up(tm, _SUBLANES), b8))
    # Produce >= 2 batch blocks when there is enough work: feeds both v7x
    # TensorCores; one extra ~0.35us grid step is noise on v5e/v6e.
    if tm_eff >= b8 and b8 >= 2 * _SUBLANES:
        tm_eff = _round_up(pl.cdiv(b8, 2), _SUBLANES)

    # VMEM budget (conservative for v7x: 64 MiB physical).  x tile is double
    # buffered; W and out blocks are lane-padded to 128 in VMEM.
    itemsize = jnp.dtype(matmul_dtype).itemsize

    def _vmem_bytes(t):
        x_buf = 2 * t * K * itemsize            # double-buffered x tile
        w_buf = K * _LANES * 4                  # resident W (lane-padded, worst case)
        o_buf = 2 * t * _LANES * 4              # out tile (lane-padded, worst case)
        return x_buf + w_buf + o_buf

    vmem_budget = 40 * 1024 * 1024
    while tm_eff > _SUBLANES and _vmem_bytes(tm_eff) > vmem_budget:
        tm_eff = max(_SUBLANES, _round_up(tm_eff // 2, _SUBLANES))
    vmem_limit = int(min(60 * 1024 * 1024,
                         max(32 * 1024 * 1024, _vmem_bytes(tm_eff) * 3 // 2)))

    n_bt = pl.cdiv(batch, tm_eff)

    cost = pl.CostEstimate(
        flops=2 * batch * K * 3,
        transcendentals=0,
        bytes_accessed=batch * K * itemsize + K * 3 * itemsize
                       + batch * 3 * 4 + 3 * 4,
    )

    out = pl.pallas_call(
        _symm_matmul_kernel,
        out_shape=jax.ShapeDtypeStruct((batch, 3), jnp.float32),
        grid_spec=pltpu.PrefetchScalarGridSpec(
            num_scalar_prefetch=0,
            grid=(n_bt,),
            in_specs=[
                # x: batch-tiled, full K (no K padding needed -> full-dim block).
                pl.BlockSpec((tm_eff, K), lambda i: (i, 0)),
                # W_stacked: constant index_map -> DMA'd once, stays resident.
                pl.BlockSpec((K, 3), lambda i: (0, 0)),
                # nIntPts * bias: tiny resident block, folded into the epilogue.
                pl.BlockSpec((1, 3), lambda i: (0, 0)),
            ],
            out_specs=pl.BlockSpec((tm_eff, 3), lambda i: (i, 0)),
        ),
        compiler_params=pltpu.CompilerParams(
            dimension_semantics=("parallel",),
            vmem_limit_bytes=vmem_limit,
        ),
        cost_estimate=cost,
    )(x, w_stacked, b)

    if squeeze:
        out = out[0]
    return out


def _reference(x, weight, bias, nIntPts):
    """Pure-JAX transcription of the original torch loop."""
    x = jnp.atleast_2d(jnp.asarray(x, jnp.float32))
    out = jnp.zeros((x.shape[0], 3), jnp.float32)
    sp = jax.nn.softplus
    for i in range(nIntPts):
        M = jnp.zeros((3, 3), jnp.float32)
        M = M.at[0, 0].set(sp(weight[i, 0]))
        M = M.at[1, 1].set(sp(weight[i, 3]))
        M = M.at[2, 2].set(sp(weight[i, 5]))
        M = M.at[0, 1].set(weight[i, 1])
        M = M.at[0, 2].set(weight[i, 2])
        M = M.at[1, 2].set(weight[i, 4])
        wBlock = M.T @ M
        y = x[:, 3 * i:3 * (i + 1)] @ wBlock.T
        if bias is not None:
            y = y + bias
        out = out + y
    return out


if __name__ == "__main__":
    key = jax.random.PRNGKey(0)
    k_x, k_w, k_b = jax.random.split(key, 3)

    nIntPts = 8            # integration points -> input features = 3*nIntPts
    batch = 16
    x = jax.random.normal(k_x, (batch, 3 * nIntPts), dtype=jnp.float32)
    weight = 0.5 * jax.random.normal(k_w, (nIntPts, 6), dtype=jnp.float32)
    bias = 0.1 * jax.random.normal(k_b, (3,), dtype=jnp.float32)

    ref = _reference(x, weight, bias, nIntPts)

    # f32 path: tight check against the reference.
    out = jax.block_until_ready(symm_layer_forward(x, weight, bias, nIntPts))
    assert out.shape == (batch, 3)
    assert jnp.allclose(out, ref, atol=1e-4, rtol=1e-4)

    # bf16 MXU feed (caller supplies bf16 x -> half the HBM read traffic),
    # f32 accumulation; loosened tolerance for the input rounding.
    out_bf16 = jax.block_until_ready(
        symm_layer_forward(x.astype(jnp.bfloat16), weight, bias, nIntPts))
    assert out_bf16.shape == (batch, 3)
    assert jnp.allclose(out_bf16, ref, atol=5e-2, rtol=5e-2)

    # 1-D input path (torch batch_size==1 branch) returns shape (3,).
    out1 = jax.block_until_ready(symm_layer_forward(x[0], weight, bias, nIntPts))
    assert out1.shape == (3,)
    assert jnp.allclose(out1, ref[0], atol=1e-4, rtol=1e-4)

    print("KERNEL_OK")
</pallas_src>

<mosaic_0001>
module attributes {stable_mosaic.version = 11 : i64} {
  func.func @_symm_matmul_kernel(%arg0: i32, %arg1: memref<8x24xf32, #tpu.memory_space<vmem>>, %arg2: memref<24x3xf32, #tpu.memory_space<vmem>>, %arg3: memref<1x3xf32, #tpu.memory_space<vmem>>, %arg4: memref<8x3xf32, #tpu.memory_space<vmem>>) attributes {dimension_semantics = [#tpu.dimension_semantics<parallel>], iteration_bounds = array<i64: 2>, scalar_prefetch = 0 : i64, scratch_operands = 0 : i64, tpu.core_type = #tpu.core_type<tc>, window_params = [{transform_indices = @transform_0, window_bounds = array<i64: 8, 24>}, {pipeline_mode = #tpu.pipeline_mode<synchronous>, transform_indices = @transform_1, window_bounds = array<i64: 24, 3>}, {pipeline_mode = #tpu.pipeline_mode<synchronous>, transform_indices = @transform_2, window_bounds = array<i64: 1, 3>}, {transform_indices = @transform_3, window_bounds = array<i64: 8, 3>}]} {
    %c0 = arith.constant 0 : index
    %c0_0 = arith.constant 0 : index
    %0 = vector.load %arg1[%c0, %c0_0] : memref<8x24xf32, #tpu.memory_space<vmem>>, vector<8x24xf32>
    %c0_1 = arith.constant 0 : index
    %c0_2 = arith.constant 0 : index
    %1 = vector.load %arg2[%c0_1, %c0_2] : memref<24x3xf32, #tpu.memory_space<vmem>>, vector<24x3xf32>
    %cst = arith.constant dense<0.000000e+00> : vector<8x3xf32>
    %2 = tpu.matmul %0, %1, %cst {dimension_numbers = #tpu.dot_dimension_numbers<[1], [0], [0], [1], [0, 0, 1, 1], [], []>} : vector<8x24xf32>, vector<24x3xf32>, vector<8x3xf32> -> vector<8x3xf32>
    %c0_3 = arith.constant 0 : index
    %c0_4 = arith.constant 0 : index
    %3 = vector.load %arg3[%c0_3, %c0_4] : memref<1x3xf32, #tpu.memory_space<vmem>>, vector<1x3xf32>
    %4 = vector.broadcast %3 : vector<1x3xf32> to vector<8x3xf32>
    %5 = arith.addf %2, %4 : vector<8x3xf32>
    %c0_5 = arith.constant 0 : index
    %c0_6 = arith.constant 0 : index
    %6 = vector.load %arg4[%c0_5, %c0_6] : memref<8x3xf32, #tpu.memory_space<vmem>>, vector<8x3xf32>
    tpu.vector_store %arg4[%c0_5, %c0_6], %5 {strides = array<i32>} : memref<8x3xf32, #tpu.memory_space<vmem>>, vector<8x3xf32>,
    return
  }
  func.func @transform_0(%arg0: i32) -> (i32, i32) {
    %c0_i32 = arith.constant 0 : i32
    %c0_i32_0 = arith.constant 0 : i32
    return %arg0, %c0_i32 : i32, i32
  }
  func.func @transform_1(%arg0: i32) -> (i32, i32) {
    %c0_i32 = arith.constant 0 : i32
    %c0_i32_0 = arith.constant 0 : i32
    %c0_i32_1 = arith.constant 0 : i32
    return %c0_i32, %c0_i32_0 : i32, i32
  }
  func.func @transform_2(%arg0: i32) -> (i32, i32) {
    %c0_i32 = arith.constant 0 : i32
    %c0_i32_0 = arith.constant 0 : i32
    %c0_i32_1 = arith.constant 0 : i32
    return %c0_i32, %c0_i32_0 : i32, i32
  }
  func.func @transform_3(%arg0: i32) -> (i32, i32) {
    %c0_i32 = arith.constant 0 : i32
    %c0_i32_0 = arith.constant 0 : i32
    return %arg0, %c0_i32 : i32, i32
  }
}

</mosaic_0001>

<bundles_post_ra>
// kernel: tpu_custom_call.1
= control target key start
LH: loop header
LB: loop body
LE: loop exit
PB: predicated region body
PF: predicated region fallthrough
CT: control target
= control target key end

     0   :  { %s375_s12 = smov 0   ;;  %s404_s0 = inlined_call_operand.vmem [shape: f32[16,24], index: 0, kind: input, shape index: {}]   ;;  %s405_s1 = inlined_call_operand.vmem [shape: f32[24,3], index: 1, kind: input, shape index: {}]   ;;  %s406_s2 = inlined_call_operand.vmem [shape: f32[1,3], index: 2, kind: input, shape index: {}]   ;;  %s407_s3 = inlined_call_operand.vmem [shape: f32[16,3], index: 3, kind: output, shape index: {}]  }
   0x1 LB: > { %s306_s13 = sadd.s32 4294967295, %s350_s12   ;;  %p310_p0 = scmp.ge.s32.totalorder %s350_s12, 1  ;;  %s350_s12 = sphi %s375_s12, %s13_s12  }
   0x2   : > { %p136_p1 = scmp.lt.s32.totalorder %s350_s12, 3 }
   0x4   : > { %p137_p2 = pnand %p310_p0, %p136_p1 }
   0x5   : > { %v167_v0 = vld [vmem:[%s405_s1] sm:$0xff] (!%p137_p2)  ;;  %v168_v1 = vld [vmem:[%s405_s1 + $0x8] sm:$0xff] (!%p137_p2)  ;;  %v352_v2 = vmov (!%p137_p2), 0.0|0.0   ;;  %vm353_vm0 = vmmov (!%p137_p2), 0   ;;  %v354_v4 = vmov (!%p137_p2), 0.0   ;;  %p158_p3 = scmp.lt.s32.totalorder (!%p137_p2), %s306_s13, 1 }
   0x6   : > { %140 = sbr.rel (%p137_p2) target bundleno = 232 (0xe8), region = 32  ;;  %330 = vmatprep.subr.bf16.mxu0 (!%p137_p2), %v352_v2  ;;  %v331_v3 = vpack.c.bf16 (!%p137_p2), %v168_v1, %v167_v0  ;;  %327 = vmatprep.mubr.msk.f32.mxu0 (!%p137_p2), %vm353_vm0, %v354_v4  ;;  %v169_v5 = vld [vmem:[%s405_s1 + $0x10] sm:$0xff] (!%p137_p2)  ;;  %vm177_vm1 = vcmask (!%p137_p2), 195584   ;;  %v313_v7 = vld [vmem:[%s406_s2] ss:$0 sm:$0xff] (!%p137_p2)  ;;  %vm251_vm2 = vcmask (!%p137_p2), 23552  }
   0x8   : > { %332 = vmatpush3.bf16.msra.mxu0 (!%p137_p2), %v331_v3 }
   0x9   : > { %325 = vmatprep.subr.mxu0 (!%p137_p2), %v354_v4 }
   0xc   : > { %326 = vmatpush3.msra.mxu0 (!%p137_p2), %v169_v5 }
   0xd   : > { %s409_s13 = smov (!%p158_p3, %s306_s13), 1 }
   0xe   : > { %s311_s20 = sshll.u32 %s409_s13, 3 }
   0xf   : > { %s161_s23 = scalar_lea.vmem %s404_s0, %s311_s20  ;;  %s165_s28 = scalar_lea.vmem %s407_s3, %s311_s20 }
  0x10   : > { %v166_v6 = vld [vmem:[%s161_s23] sm:$0xff] }
  0x11   : > { %328 = vmatmul.mubr.msk.f32.vlgmr.msra.gmra.mrb[0].mxu0 %vm177_vm1, %v166_v6 }
  0xe4   : > { %v247_v8 = vpop.f32.mrb[0].mxu0 }
  0xe5   : > { %v248_v9 = vadd.f32 %v313_v7, %v247_v8  ;;  %v329_v10 = vpop.f32.mrb[1].mxu0 }
  0xe7   : > { %252 = vst.msk [vmem:[%s165_s28] sm:$0xff] %vm251_vm2, %v248_v9 }
  0xe8 PF: > { %s13_s12 = sadd.s32 1, %s350_s12  }
  0xe9   : > { %p10_p4 = scmp.ge.s32.totalorder %s13_s12, 4  }
  0xeb   :  { %12 = sbr.rel (!%p10_p4) target bundleno = 1 (0x1), region = 62 }

</bundles_post_ra>
